<compile_context>
chip_gen: v6e
topology: v6e:2x2x1
jax: 0.10.0
libtpu: 0.0.40
codegen_flags: <defaults>
</compile_context>

<pallas_src>
import functools

import jax
import jax.numpy as jnp
from jax.experimental import pallas as pl
from jax.experimental.pallas import tpu as pltpu


# ---------------------------------------------------------------------------
# Kernels
# ---------------------------------------------------------------------------

def _row_reduce_single_kernel(x_ref, o_ref, *, scale):
    """Whole reduction axis in one block: sum + scale, no accumulator/scratch."""
    x = x_ref[...].astype(jnp.float32)
    o_ref[...] = (jnp.sum(x, axis=-1, keepdims=True) * scale).astype(o_ref.dtype)


def _row_reduce_kernel(x_ref, o_ref, acc_ref, *, scale, col_tile, last_valid,
                       needs_mask):
    """Row-wise reduction tiled along the lane (reduction) axis.

    Accumulates lane-dense (row_tile, 128) f32 partial sums (VPU-only adds);
    the single cross-lane (XLU) reduce + scale happens in the k == last
    epilogue.  The OOB column mask (if any) is applied only on the last tile.
    """
    k = pl.program_id(1)
    last = pl.num_programs(1) - 1
    row_tile = x_ref.shape[0]
    n128 = col_tile // 128

    @pl.when(k == 0)
    def _():
        acc_ref[...] = jnp.zeros_like(acc_ref)

    def _accumulate(x):
        # (row_tile, col_tile) -> (row_tile, n128, 128): pure lane-dim split,
        # sum over the middle axis is vreg-wise VPU adds (no cross-lane work).
        acc_ref[...] += x.reshape(row_tile, n128, 128).sum(axis=1)

    if needs_mask:
        @pl.when(k != last)
        def _():
            _accumulate(x_ref[...].astype(jnp.float32))

        @pl.when(k == last)
        def _():
            x = x_ref[...].astype(jnp.float32)
            lane = jax.lax.broadcasted_iota(jnp.int32, (1, col_tile), 1)
            _accumulate(jnp.where(lane < last_valid, x, 0.0))
    else:
        _accumulate(x_ref[...].astype(jnp.float32))

    @pl.when(k == last)
    def _():
        total = jnp.sum(acc_ref[...], axis=-1, keepdims=True)
        o_ref[...] = (total * scale).astype(o_ref.dtype)


# ---------------------------------------------------------------------------
# Tiling / wrapper
# ---------------------------------------------------------------------------

_DEFAULT_BLOCK_BUDGET = 4 << 20     # ~4 MiB per input block: HBM roofline is
                                    # saturated well before this; bigger blocks
                                    # only burn VMEM (critical on v7x's 64 MiB).


def _vmem_capacity_bytes():
    try:
        return int(pltpu.get_tpu_info().vmem_capacity_bytes)
    except Exception:
        return 64 << 20             # v7x floor -- safe on every generation


def _round_up(x, m):
    return ((x + m - 1) // m) * m


def _choose_row_tile(rows):
    if rows < 16:
        return rows                                   # full extent (always legal)
    # Split rows across >= 2 blocks so both v7x TensorCores get work on the
    # "parallel" axis; blocks are sublane-friendly (mult. of 8), capped at 1024.
    return min(1024, _round_up(pl.cdiv(rows, 2), 8))


def _choose_col_tile(cols, itemsize, row_tile, block_budget):
    max_cols = max(block_budget // (row_tile * itemsize), 128)
    if cols <= max_cols:
        return cols, False                            # single step, no mask
    cap = (max_cols // 128) * 128
    # Prefer the largest 128-multiple divisor of cols <= cap so no masking is
    # needed at all.
    d = cap
    while d >= 128:
        if cols % d == 0:
            return d, False
        d -= 128
    return cap, (cols % cap != 0)


def einops_reduce_bchw_to_bc(x, reduction="mean", *,
                             block_budget_bytes=_DEFAULT_BLOCK_BUDGET):
    """einops.reduce(x, 'b c h w -> b c', reduction) via a Pallas TPU kernel."""
    B, C, H, W = x.shape
    rows, cols = B * C, H * W
    x2 = x.reshape(rows, cols)        # lane-contiguous slab: contiguous DMA/block

    itemsize = jnp.dtype(x.dtype).itemsize
    vmem_cap = _vmem_capacity_bytes()

    row_tile = _choose_row_tile(rows)
    col_tile, needs_mask = _choose_col_tile(cols, itemsize, row_tile,
                                            block_budget_bytes)

    n_row_steps = pl.cdiv(rows, row_tile)
    n_col_steps = pl.cdiv(cols, col_tile)
    scale = (1.0 / cols) if reduction == "mean" else 1.0

    # VMEM accounting: pipelined input buffers + block-sized f32 temporaries
    # (upcast / masked copy) + headroom for accumulator & output.
    in_block_bytes = row_tile * col_tile * itemsize
    f32_block_bytes = row_tile * col_tile * 4
    n_buffers = 3 if n_col_steps >= 3 else 2
    vmem_limit = min(int(0.75 * vmem_cap),
                     max(32 << 20,
                         n_buffers * in_block_bytes + 2 * f32_block_bytes
                         + (8 << 20)))

    if n_col_steps == 1:
        kernel = functools.partial(_row_reduce_single_kernel, scale=scale)
        grid = (n_row_steps,)
        in_specs = [pl.BlockSpec((row_tile, col_tile), lambda i: (i, 0))]
        out_specs = pl.BlockSpec((row_tile, 1), lambda i: (i, 0))
        scratch_shapes = []
        dim_sem = ("parallel",)
    else:
        last_valid = cols - (n_col_steps - 1) * col_tile
        kernel = functools.partial(
            _row_reduce_kernel, scale=scale, col_tile=col_tile,
            last_valid=last_valid, needs_mask=needs_mask)
        grid = (n_row_steps, n_col_steps)
        block_shape = (row_tile, col_tile)
        index_map = lambda i, k: (i, k)
        if n_buffers == 3:
            try:
                in_spec = pl.BlockSpec(block_shape, index_map,
                                       pipeline_mode=pl.Buffered(3))
            except (TypeError, AttributeError):
                in_spec = pl.BlockSpec(block_shape, index_map)
        else:
            in_spec = pl.BlockSpec(block_shape, index_map)
        in_specs = [in_spec]
        out_specs = pl.BlockSpec((row_tile, 1), lambda i, k: (i, 0))
        scratch_shapes = [pltpu.VMEM((row_tile, 128), jnp.float32)]
        dim_sem = ("parallel", "arbitrary")

    out = pl.pallas_call(
        kernel,
        out_shape=jax.ShapeDtypeStruct((rows, 1), x.dtype),
        grid_spec=pltpu.PrefetchScalarGridSpec(
            num_scalar_prefetch=0,
            grid=grid,
            in_specs=in_specs,
            out_specs=out_specs,
            scratch_shapes=scratch_shapes,
        ),
        compiler_params=pltpu.CompilerParams(
            dimension_semantics=dim_sem,
            vmem_limit_bytes=vmem_limit,
        ),
    )(x2)
    return out.reshape(B, C)


class Reduce:
    """JAX/Pallas counterpart of the PyTorch Reduce module (fixed recipe)."""

    # TODO(synk): general einops recipes / other reductions (max, min, prod,
    # axis regrouping) are not implemented; only 'b c h w -> b c' mean/sum.
    def __init__(self, recipe="b c h w -> b c", reduction="mean", **kwargs):
        assert recipe == "b c h w -> b c" and reduction in ("mean", "sum"), (
            "This Pallas kernel implements the 'b c h w -> b c' mean/sum recipe.")
        self.recipe = recipe
        self.reduction = reduction
        self.kwargs = kwargs

    def __call__(self, x):
        return einops_reduce_bchw_to_bc(x, self.reduction)


if __name__ == "__main__":
    key = jax.random.PRNGKey(0)

    # 1) Primary test shape (matches the module's typical use) -- single-step path.
    B, C, H, W = 2, 4, 16, 16
    x = jax.random.normal(key, (B, C, H, W), dtype=jnp.float32)
    out = jax.block_until_ready(Reduce("b c h w -> b c", "mean")(x))
    ref = jnp.mean(x, axis=(2, 3))
    assert out.shape == (B, C), out.shape
    assert jnp.allclose(out, ref, atol=1e-5, rtol=1e-5), (out, ref)

    # 2) Sum reduction.
    out_s = jax.block_until_ready(Reduce("b c h w -> b c", "sum")(x))
    ref_s = jnp.sum(x, axis=(2, 3))
    assert jnp.allclose(out_s, ref_s, atol=1e-4, rtol=1e-5), (out_s, ref_s)

    # 3) Odd, non-(8,128)-aligned shape exercises the full-dim block path.
    x2 = jax.random.normal(jax.random.PRNGKey(1), (2, 3, 5, 7), dtype=jnp.float32)
    out2 = jax.block_until_ready(Reduce("b c h w -> b c", "mean")(x2))
    ref2 = jnp.mean(x2, axis=(2, 3))
    assert jnp.allclose(out2, ref2, atol=1e-5, rtol=1e-5), (out2, ref2)

    # 4) Tiny forced block budget exercises the multi-column-step accumulator
    #    path with last-tile masking, 2 row blocks, and 3-deep buffering.
    x3 = jax.random.normal(jax.random.PRNGKey(2), (2, 8, 16, 17), dtype=jnp.float32)
    out3 = jax.block_until_ready(
        einops_reduce_bchw_to_bc(x3, "mean", block_budget_bytes=4096))
    ref3 = jnp.mean(x3, axis=(2, 3))
    assert jnp.allclose(out3, ref3, atol=1e-5, rtol=1e-5), (out3, ref3)

    # 5) Multi-step path where a 128-multiple divisor of H*W exists (no mask).
    x4 = jax.random.normal(jax.random.PRNGKey(3), (2, 8, 16, 24), dtype=jnp.float32)
    out4 = jax.block_until_ready(
        einops_reduce_bchw_to_bc(x4, "mean", block_budget_bytes=4096))
    ref4 = jnp.mean(x4, axis=(2, 3))
    assert jnp.allclose(out4, ref4, atol=1e-5, rtol=1e-5), (out4, ref4)

    print("KERNEL_OK")
</pallas_src>

<mosaic_0001>
module attributes {stable_mosaic.version = 11 : i64} {
  func.func @_row_reduce_single_kernel(%arg0: i32, %arg1: memref<8x256xf32, #tpu.memory_space<vmem>>, %arg2: memref<8x1xf32, #tpu.memory_space<vmem>>) attributes {dimension_semantics = [#tpu.dimension_semantics<parallel>], iteration_bounds = array<i64: 1>, scalar_prefetch = 0 : i64, scratch_operands = 0 : i64, tpu.core_type = #tpu.core_type<tc>, window_params = [{transform_indices = @transform_0, window_bounds = array<i64: 8, 256>}, {transform_indices = @transform_1, window_bounds = array<i64: 8, 1>}]} {
    %c0 = arith.constant 0 : index
    %c0_0 = arith.constant 0 : index
    %0 = vector.load %arg1[%c0, %c0_0] : memref<8x256xf32, #tpu.memory_space<vmem>>, vector<8x256xf32>
    %cst = arith.constant dense<0.000000e+00> : vector<8xf32>
    %1 = vector.multi_reduction <add>, %0, %cst [1] : vector<8x256xf32> to vector<8xf32>
    %2 = vector.shape_cast %1 : vector<8xf32> to vector<8x1xf32>
    %cst_1 = arith.constant 3.906250e-03 : f32
    %3 = vector.broadcast %cst_1 : f32 to vector<8x1xf32>
    %4 = arith.mulf %2, %3 : vector<8x1xf32>
    %c0_2 = arith.constant 0 : index
    %c0_3 = arith.constant 0 : index
    %5 = vector.load %arg2[%c0_2, %c0_3] : memref<8x1xf32, #tpu.memory_space<vmem>>, vector<8x1xf32>
    tpu.vector_store %arg2[%c0_2, %c0_3], %4 {strides = array<i32>} : memref<8x1xf32, #tpu.memory_space<vmem>>, vector<8x1xf32>,
    return
  }
  func.func @transform_0(%arg0: i32) -> (i32, i32) {
    %c0_i32 = arith.constant 0 : i32
    %c0_i32_0 = arith.constant 0 : i32
    return %arg0, %c0_i32 : i32, i32
  }
  func.func @transform_1(%arg0: i32) -> (i32, i32) {
    %c0_i32 = arith.constant 0 : i32
    %c0_i32_0 = arith.constant 0 : i32
    return %arg0, %c0_i32 : i32, i32
  }
}

</mosaic_0001>

<bundles_post_ra>
// kernel: tpu_custom_call.1
= control target key start
LH: loop header
LB: loop body
LE: loop exit
PB: predicated region body
PF: predicated region fallthrough
CT: control target
= control target key end

     0   :  { %6 = vsyncpa [#allocation3], 0  ;;  %s56_s6 = smov [#allocation2]   ;;  %s73_s0 = inlined_call_operand.hbm [shape: f32[8,256], index: 0, kind: input, shape index: {}]   ;;  %s74_s1 = inlined_call_operand.vmem [shape: f32[8,1], index: 1, kind: output, shape index: {}]  }
   0x1   :  { %s13_s7 = sshll.u32 %s56_s6, 4  ;;  %s14_s7 = int_to_ptr.vmem [resolvable:$true] %s13_s7 }
   0x2   :  { %s42_s8 = scalar_lea.vmem %s14_s7, 256  ;;  %p47_p1 = scmp.lt.s32.totalorder %s14_s7, %s14_s7 }
   0x3   :  { %p43_p0 = scmp.ne.s32.totalorder %s14_s7, %s42_s8  ;;  %p48_p2 = scmp.lt.s32.totalorder %s42_s8, %s42_s8 }
   0x5   :  { %p49_p3 = por %p48_p2, %p47_p1 }
   0x7   :  { %p50_p4 = pnand %p49_p3, %p43_p0 }
   0x9   :  { %53 = shalt.err (!%p50_p4)
}
   0xa   :  { %16 = dma.hbm_to_vmem [thread:$0]  %s73_s0, 256, %s14_s7, [#allocation3]  }
   0xb   :  { %54 = dma.done.wait [#allocation3], 256  }
   0xc   :  { %55 = vsyncadd [#allocation3], 4294967040  ;;  %v20_v0 = vld [vmem:[#allocation2] sm:$0xff]  ;;  %v21_v1 = vld [vmem:[#allocation2 + $0x8] sm:$0xff]  ;;  %vm26_vm0 = vcmask 7168  }
   0xd   :  { %v22_v2 = vadd.f32 %v21_v1, %v20_v0 }
   0xf   :  { %23 = vadd.xlane.f32.xlu0 %v22_v2 }
  0x98   :  { %v24_v3 = vpop.xlane.xlu0 %23 }
  0x99   :  { %v25_v4 = vmul.f32 0.00390625, %v24_v3 }
  0x9b   :  { %27 = vst.msk [vmem:[%s74_s1] sm:$0xff] %vm26_vm0, %v25_v4 }
  0x9c   :  { %32 = vsyncpa [#allocation3], 1 }

</bundles_post_ra>
